<compile_context>
chip_gen: v6e
topology: v6e:2x2x1
jax: 0.10.0
libtpu: 0.0.40
codegen_flags: <defaults>
</compile_context>

<pallas_src>
import functools

import jax
import jax.numpy as jnp
from jax.experimental import pallas as pl
from jax.experimental.pallas import tpu as pltpu


def _round_up(x, m):
    return ((x + m - 1) // m) * m


def _vmem_capacity_bytes():
    """Best-effort VMEM capacity query; conservative (v7x, 64 MiB) if unavailable."""
    try:
        info = pltpu.get_tpu_info()
        for name in ("vmem_capacity_bytes", "vmem_size_bytes", "vmem_bytes"):
            v = getattr(info, name, None)
            if v:
                return int(v)
    except Exception:
        pass
    return 64 * 1024 * 1024


def _ensemble_kernel(x1_ref, x2_ref, w1_ref, w2_ref, b2_ref, o_ref):
    """Grid = (batch tile i [parallel], member group g [arbitrary]).

    x1_ref, x2_ref : (TB, Fp)  pair features, zero-padded; column F holds 1.0 (bias fold)
    w1_ref         : (Fp, Gh)  this group's first-layer weights (+ b1 in row F)
    w2_ref         : (Gh, E)   block-diagonal second-layer weights (this group's rows)
    b2_ref         : (1, E)    2 * second-layer biases (applied once, at g == 0)
    o_ref          : (TB, E)   lane-dense output tile, accumulated over groups
    """
    g = pl.program_id(1)

    w1 = w1_ref[...]
    # Two stage-1 dots (no concat/split); bias folded into W1 -> only ReLU on the VPU.
    h1 = jnp.maximum(jnp.dot(x1_ref[...], w1, preferred_element_type=jnp.float32), 0.0)
    h2 = jnp.maximum(jnp.dot(x2_ref[...], w1, preferred_element_type=jnp.float32), 0.0)

    # s1 + s2 == (relu(.)+relu(.)) @ W2 + 2*b2 ; stage-2 operands in W2's dtype.
    hsum = (h1 + h2).astype(w2_ref.dtype)
    part = jnp.dot(hsum, w2_ref[...], preferred_element_type=jnp.float32)

    @pl.when(g == 0)
    def _():
        o_ref[...] = (part + b2_ref[...]).astype(o_ref.dtype)

    @pl.when(g > 0)
    def _():
        o_ref[...] = o_ref[...] + part.astype(o_ref.dtype)


@functools.partial(
    jax.jit, static_argnames=("use_bf16", "n_groups", "single_buffer_weights"))
def _ensemble_forward_impl(x1, x2, w1, b1, w2, b2, *, use_bf16, n_groups,
                           single_buffer_weights):
    E, F, H = w1.shape
    B = x1.shape[0]

    x_dtype = jnp.bfloat16 if use_bf16 else x1.dtype
    w_dtype = jnp.bfloat16 if use_bf16 else w1.dtype
    x_it = jnp.dtype(x_dtype).itemsize
    w_it = jnp.dtype(w_dtype).itemsize

    # ---- lane / contraction padding (done once, on the weights) ------------------
    Fp = _round_up(F + 1, 128)          # +1: bias row folded into the stage-1 matmul
    Hp = _round_up(H, 128)              # per-member hidden width aligned to lane tiles

    # ---- generation-aware budgets -------------------------------------------------
    vmem_cap = _vmem_capacity_bytes()
    budget = int(vmem_cap * 0.70)
    vmem_limit = (100 << 20) if vmem_cap >= (128 << 20) else (48 << 20)
    tb_cap = 512 if vmem_cap >= (128 << 20) else 256

    # ---- ensemble-member group tiling (bounds resident weights on 64 MiB chips) ---
    if n_groups is None:
        n_groups = E
        for g in range(1, E + 1):
            if E % g == 0:
                gh = (E // g) * Hp
                if 2 * (Fp * gh + gh * E) * w_it <= budget // 2:
                    n_groups = g
                    break
    assert E % n_groups == 0, "n_groups must divide the ensemble size"
    Eg = E // n_groups
    Gh = Eg * Hp

    # ---- batch tile selection ------------------------------------------------------
    row_mult = 16 if x_it == 2 else 8           # bf16 packs 16 rows per sublane tile
    TB = min(tb_cap, _round_up(B, row_mult))

    weight_bufs = 1 if (single_buffer_weights and n_groups == 1) else 2

    def vmem_est(tb):
        wb = weight_bufs * (Fp * Gh + Gh * E) * w_it
        xio = 2 * (2 * tb * Fp * x_it) + 2 * (tb * E * 4)
        inter = tb * Gh * (2 * 4 + w_it)        # h1, h2 (f32) + hsum
        return wb + xio + inter

    while TB > row_mult and vmem_est(TB) > budget:
        TB = max(row_mult, _round_up(TB // 2, row_mult))
    B_pad = _round_up(B, TB)

    # ---- batch all member parameters (once, outside the kernel) -------------------
    # W1 with bias row: column index c = e*Hp + h.
    w1p = jnp.pad(w1, ((0, 0), (0, 0), (0, Hp - H)))                    # (E, F, Hp)
    b1p = jnp.pad(b1.reshape(E, 1, H), ((0, 0), (0, 0), (0, Hp - H)))   # (E, 1, Hp)
    w1b = jnp.concatenate([w1p, b1p], axis=1)                           # (E, F+1, Hp)
    w1b = jnp.pad(w1b, ((0, 0), (0, Fp - (F + 1)), (0, 0)))             # (E, Fp, Hp)
    w1_all = jnp.transpose(w1b, (1, 0, 2)).reshape(Fp, E * Hp).astype(w_dtype)

    # Block-diagonal stage-2 weights: row index r = e*Hp + h, column e.
    w2p = jnp.pad(w2.reshape(E, H), ((0, 0), (0, Hp - H)))              # (E, Hp)
    eye = jnp.eye(E, dtype=w2.dtype)
    w2_block = (w2p[:, :, None] * eye[:, None, :]).reshape(E * Hp, E).astype(w_dtype)

    b2_row = (2.0 * b2.reshape(1, E)).astype(jnp.float32)               # b2 hits both drugs

    # ---- inputs: cast, pad features, set bias column, pad batch --------------------
    def prep_x(x):
        xp = jnp.pad(x.astype(x_dtype), ((0, 0), (0, Fp - F)))
        xp = xp.at[:, F].set(jnp.asarray(1.0, dtype=x_dtype))
        if B_pad != B:
            xp = jnp.pad(xp, ((0, B_pad - B), (0, 0)))
        return xp

    x1p = prep_x(x1)
    x2p = prep_x(x2)

    # ---- BlockSpecs -----------------------------------------------------------------
    const_kwargs = {}
    if weight_bufs == 1:
        # Grid-invariant weight blocks: single-buffer them.
        const_kwargs = dict(pipeline_mode=pl.Buffered(1))

    in_specs = [
        pl.BlockSpec((TB, Fp), lambda i, g: (i, 0)),                    # x1 tile
        pl.BlockSpec((TB, Fp), lambda i, g: (i, 0)),                    # x2 tile
        pl.BlockSpec((Fp, Gh), lambda i, g: (0, g), **const_kwargs),    # W1 group block
        pl.BlockSpec((Gh, E), lambda i, g: (g, 0), **const_kwargs),     # W2 group block
        pl.BlockSpec((1, E), lambda i, g: (0, 0), **const_kwargs),      # 2*b2
    ]
    out_spec = pl.BlockSpec((TB, E), lambda i, g: (i, 0))               # lane-dense output

    out = pl.pallas_call(
        _ensemble_kernel,
        out_shape=jax.ShapeDtypeStruct((B_pad, E), jnp.float32),
        grid=(B_pad // TB, n_groups),
        in_specs=in_specs,
        out_specs=out_spec,
        compiler_params=pltpu.CompilerParams(
            dimension_semantics=("parallel", "arbitrary"),
            vmem_limit_bytes=vmem_limit,
        ),
    )(x1p, x2p, w1_all, w2_block, b2_row)

    return out[:B]                                                       # [B, E]


def ensemble_forward(x1, x2, w1, b1, w2, b2, *, use_bf16=True, n_groups=None):
    """Run all ensemble members; returns [B, E] (matches torch.cat(comb_list, dim=1)).

    x1, x2 : (B, F)      gathered pair features
    w1     : (E, F, H)   per-member first linear weight
    b1     : (E, 1, H)   per-member first linear bias
    w2     : (E, H, 1)   per-member output linear weight
    b2     : (E, 1, 1)   per-member output linear bias
    """
    try:
        return jax.block_until_ready(_ensemble_forward_impl(
            x1, x2, w1, b1, w2, b2, use_bf16=use_bf16, n_groups=n_groups,
            single_buffer_weights=True))
    except Exception:
        # Fallback if pipeline_mode=pl.Buffered(1) is not supported by this JAX build.
        return jax.block_until_ready(_ensemble_forward_impl(
            x1, x2, w1, b1, w2, b2, use_bf16=use_bf16, n_groups=n_groups,
            single_buffer_weights=False))


def _reference_forward(x1, x2, w1, b1, w2, b2):
    """Pure-JAX reference (per-member torch-style MLP, as in EnsembleModel.forward)."""
    def member(w1_e, b1_e, w2_e, b2_e):
        h1 = jnp.maximum(x1 @ w1_e + b1_e, 0.0)
        h2 = jnp.maximum(x2 @ w1_e + b1_e, 0.0)
        return (h1 @ w2_e + b2_e) + (h2 @ w2_e + b2_e)    # (B, 1)
    cols = [member(w1[e], b1[e], w2[e], b2[e]) for e in range(w1.shape[0])]
    return jnp.concatenate(cols, axis=1)                   # (B, E)


if __name__ == "__main__":
    key = jax.random.PRNGKey(0)

    # Small synthetic problem consistent with the module's forward:
    n_drugs = 10          # rows of data.x_drugs
    F = 32                # data.x_drugs.shape[1]  -> first predictor layer size
    H = 32                # config['predictor_layers'] = [H, 1]
    E = 4                 # config['ensemble_size']
    B = 8                 # drug_drug_batch size

    k_feat, k_i1, k_i2, k_sc, k_w1, k_b1, k_w2, k_b2 = jax.random.split(key, 8)

    # data.x_drugs
    x_drugs = jax.random.normal(k_feat, (n_drugs, F), dtype=jnp.float32)

    # drug_drug_batch = (drug1_idx, drug2_idx, ground_truth_scores)
    idx1 = jax.random.randint(k_i1, (B,), 0, n_drugs)
    idx2 = jax.random.randint(k_i2, (B,), 0, n_drugs)
    scores = jax.random.normal(k_sc, (B,), dtype=jnp.float32)
    drug_drug_batch = (idx1, idx2, scores)

    # Deterministic per-member parameters (stacked on leading ensemble axis).
    w1 = jax.random.normal(k_w1, (E, F, H), dtype=jnp.float32) / jnp.sqrt(F)
    b1 = jax.random.normal(k_b1, (E, 1, H), dtype=jnp.float32) * 0.01
    w2 = jax.random.normal(k_w2, (E, H, 1), dtype=jnp.float32) / jnp.sqrt(H)
    b2 = jax.random.normal(k_b2, (E, 1, 1), dtype=jnp.float32) * 0.01

    # Glue (gather of pair features) stays in plain JAX.
    x1 = x_drugs[drug_drug_batch[0]]   # (B, F)
    x2 = x_drugs[drug_drug_batch[1]]   # (B, F)

    ref = _reference_forward(x1, x2, w1, b1, w2, b2)

    # f32 path: must match the reference tightly.
    out_f32 = ensemble_forward(x1, x2, w1, b1, w2, b2, use_bf16=False)
    assert out_f32.shape == (B, E), out_f32.shape
    assert jnp.allclose(out_f32, ref, atol=1e-4, rtol=1e-4), "f32 kernel/reference mismatch"

    # Default bf16 MXU-operand path: looser tolerance.
    out_bf16 = ensemble_forward(x1, x2, w1, b1, w2, b2)
    assert out_bf16.shape == (B, E), out_bf16.shape
    assert jnp.allclose(out_bf16, ref, atol=2e-1, rtol=2e-1), "bf16 kernel/reference mismatch"

    # Forced member-group tiling (exercises the group-accumulation grid axis).
    out_grp = ensemble_forward(x1, x2, w1, b1, w2, b2, use_bf16=False, n_groups=2)
    assert out_grp.shape == (B, E), out_grp.shape
    assert jnp.allclose(out_grp, ref, atol=1e-4, rtol=1e-4), "grouped kernel/reference mismatch"

    print("KERNEL_OK")
</pallas_src>

<mosaic_0001>
module attributes {stable_mosaic.version = 11 : i64} {
  func.func @_ensemble_kernel(%arg0: i32, %arg1: i32, %arg2: memref<8x128xf32, #tpu.memory_space<vmem>>, %arg3: memref<8x128xf32, #tpu.memory_space<vmem>>, %arg4: memref<128x512xf32, #tpu.memory_space<vmem>>, %arg5: memref<512x4xf32, #tpu.memory_space<vmem>>, %arg6: memref<1x4xf32, #tpu.memory_space<vmem>>, %arg7: memref<8x4xf32, #tpu.memory_space<vmem>>) attributes {dimension_semantics = [#tpu.dimension_semantics<parallel>, #tpu.dimension_semantics<arbitrary>], iteration_bounds = array<i64: 1, 1>, scalar_prefetch = 0 : i64, scratch_operands = 0 : i64, tpu.core_type = #tpu.core_type<tc>, window_params = [{transform_indices = @transform_0, window_bounds = array<i64: 8, 128>}, {transform_indices = @transform_1, window_bounds = array<i64: 8, 128>}, {pipeline_mode = #tpu.pipeline_mode<synchronous>, transform_indices = @transform_2, window_bounds = array<i64: 128, 512>}, {pipeline_mode = #tpu.pipeline_mode<synchronous>, transform_indices = @transform_3, window_bounds = array<i64: 512, 4>}, {pipeline_mode = #tpu.pipeline_mode<synchronous>, transform_indices = @transform_4, window_bounds = array<i64: 1, 4>}, {transform_indices = @transform_5, window_bounds = array<i64: 8, 4>}]} {
    %c0 = arith.constant 0 : index
    %c0_0 = arith.constant 0 : index
    %0 = vector.load %arg4[%c0, %c0_0] : memref<128x512xf32, #tpu.memory_space<vmem>>, vector<128x512xf32>
    %c0_1 = arith.constant 0 : index
    %c0_2 = arith.constant 0 : index
    %1 = vector.load %arg2[%c0_1, %c0_2] : memref<8x128xf32, #tpu.memory_space<vmem>>, vector<8x128xf32>
    %cst = arith.constant dense<0.000000e+00> : vector<8x512xf32>
    %2 = tpu.matmul %1, %0, %cst {dimension_numbers = #tpu.dot_dimension_numbers<[1], [0], [0], [1], [0, 0, 1, 1], [], []>} : vector<8x128xf32>, vector<128x512xf32>, vector<8x512xf32> -> vector<8x512xf32>
    %cst_3 = arith.constant 0.000000e+00 : f32
    %3 = vector.broadcast %cst_3 : f32 to vector<8x512xf32>
    %4 = arith.maximumf %2, %3 : vector<8x512xf32>
    %c0_4 = arith.constant 0 : index
    %c0_5 = arith.constant 0 : index
    %5 = vector.load %arg3[%c0_4, %c0_5] : memref<8x128xf32, #tpu.memory_space<vmem>>, vector<8x128xf32>
    %cst_6 = arith.constant dense<0.000000e+00> : vector<8x512xf32>
    %6 = tpu.matmul %5, %0, %cst_6 {dimension_numbers = #tpu.dot_dimension_numbers<[1], [0], [0], [1], [0, 0, 1, 1], [], []>} : vector<8x128xf32>, vector<128x512xf32>, vector<8x512xf32> -> vector<8x512xf32>
    %cst_7 = arith.constant 0.000000e+00 : f32
    %7 = vector.broadcast %cst_7 : f32 to vector<8x512xf32>
    %8 = arith.maximumf %6, %7 : vector<8x512xf32>
    %9 = arith.addf %4, %8 : vector<8x512xf32>
    %c0_8 = arith.constant 0 : index
    %c0_9 = arith.constant 0 : index
    %10 = vector.load %arg5[%c0_8, %c0_9] : memref<512x4xf32, #tpu.memory_space<vmem>>, vector<512x4xf32>
    %cst_10 = arith.constant dense<0.000000e+00> : vector<8x4xf32>
    %11 = tpu.matmul %9, %10, %cst_10 {dimension_numbers = #tpu.dot_dimension_numbers<[1], [0], [0], [1], [0, 0, 1, 1], [], []>} : vector<8x512xf32>, vector<512x4xf32>, vector<8x4xf32> -> vector<8x4xf32>
    %c0_i32 = arith.constant 0 : i32
    %12 = arith.cmpi eq, %arg1, %c0_i32 : i32
    %13 = arith.extui %12 : i1 to i32
    %c0_i32_11 = arith.constant 0 : i32
    %14 = arith.cmpi ne, %13, %c0_i32_11 : i32
    scf.if %14 {
      %c0_14 = arith.constant 0 : index
      %c0_15 = arith.constant 0 : index
      %18 = vector.load %arg6[%c0_14, %c0_15] : memref<1x4xf32, #tpu.memory_space<vmem>>, vector<1x4xf32>
      %19 = vector.broadcast %18 : vector<1x4xf32> to vector<8x4xf32>
      %20 = arith.addf %11, %19 : vector<8x4xf32>
      %c0_16 = arith.constant 0 : index
      %c0_17 = arith.constant 0 : index
      %21 = vector.load %arg7[%c0_16, %c0_17] : memref<8x4xf32, #tpu.memory_space<vmem>>, vector<8x4xf32>
      tpu.vector_store %arg7[%c0_16, %c0_17], %20 {strides = array<i32>} : memref<8x4xf32, #tpu.memory_space<vmem>>, vector<8x4xf32>,
    } else {
    }
    %c0_i32_12 = arith.constant 0 : i32
    %15 = arith.cmpi sgt, %arg1, %c0_i32_12 : i32
    %16 = arith.extui %15 : i1 to i32
    %c0_i32_13 = arith.constant 0 : i32
    %17 = arith.cmpi ne, %16, %c0_i32_13 : i32
    scf.if %17 {
      %c0_14 = arith.constant 0 : index
      %c0_15 = arith.constant 0 : index
      %18 = vector.load %arg7[%c0_14, %c0_15] : memref<8x4xf32, #tpu.memory_space<vmem>>, vector<8x4xf32>
      %19 = arith.addf %18, %11 : vector<8x4xf32>
      %c0_16 = arith.constant 0 : index
      %c0_17 = arith.constant 0 : index
      %20 = vector.load %arg7[%c0_16, %c0_17] : memref<8x4xf32, #tpu.memory_space<vmem>>, vector<8x4xf32>
      tpu.vector_store %arg7[%c0_16, %c0_17], %19 {strides = array<i32>} : memref<8x4xf32, #tpu.memory_space<vmem>>, vector<8x4xf32>,
    } else {
    }
    return
  }
  func.func @transform_0(%arg0: i32, %arg1: i32) -> (i32, i32) {
    %c0_i32 = arith.constant 0 : i32
    %c0_i32_0 = arith.constant 0 : i32
    return %arg0, %c0_i32 : i32, i32
  }
  func.func @transform_1(%arg0: i32, %arg1: i32) -> (i32, i32) {
    %c0_i32 = arith.constant 0 : i32
    %c0_i32_0 = arith.constant 0 : i32
    return %arg0, %c0_i32 : i32, i32
  }
  func.func @transform_2(%arg0: i32, %arg1: i32) -> (i32, i32) {
    %c0_i32 = arith.constant 0 : i32
    %c0_i32_0 = arith.constant 0 : i32
    return %c0_i32, %arg1 : i32, i32
  }
  func.func @transform_3(%arg0: i32, %arg1: i32) -> (i32, i32) {
    %c0_i32 = arith.constant 0 : i32
    %c0_i32_0 = arith.constant 0 : i32
    return %arg1, %c0_i32 : i32, i32
  }
  func.func @transform_4(%arg0: i32, %arg1: i32) -> (i32, i32) {
    %c0_i32 = arith.constant 0 : i32
    %c0_i32_0 = arith.constant 0 : i32
    %c0_i32_1 = arith.constant 0 : i32
    return %c0_i32, %c0_i32_0 : i32, i32
  }
  func.func @transform_5(%arg0: i32, %arg1: i32) -> (i32, i32) {
    %c0_i32 = arith.constant 0 : i32
    %c0_i32_0 = arith.constant 0 : i32
    return %arg0, %c0_i32 : i32, i32
  }
}

module attributes {stable_mosaic.version = 11 : i64} {
  func.func @_ensemble_kernel(%arg0: i32, %arg1: i32, %arg2: memref<8x128xf32, #tpu.memory_space<vmem>>, %arg3: memref<8x128xf32, #tpu.memory_space<vmem>>, %arg4: memref<128x512xf32, #tpu.memory_space<vmem>>, %arg5: memref<512x4xf32, #tpu.memory_space<vmem>>, %arg6: memref<1x4xf32, #tpu.memory_space<vmem>>, %arg7: memref<8x4xf32, #tpu.memory_space<vmem>>) attributes {dimension_semantics = [#tpu.dimension_semantics<parallel>, #tpu.dimension_semantics<arbitrary>], iteration_bounds = array<i64: 1, 1>, scalar_prefetch = 0 : i64, scratch_operands = 0 : i64, tpu.core_type = #tpu.core_type<tc>, window_params = [{transform_indices = @transform_0, window_bounds = array<i64: 8, 128>}, {transform_indices = @transform_1, window_bounds = array<i64: 8, 128>}, {transform_indices = @transform_2, window_bounds = array<i64: 128, 512>}, {transform_indices = @transform_3, window_bounds = array<i64: 512, 4>}, {pipeline_mode = #tpu.pipeline_mode<synchronous>, transform_indices = @transform_4, window_bounds = array<i64: 1, 4>}, {transform_indices = @transform_5, window_bounds = array<i64: 8, 4>}]} {
    %c0 = arith.constant 0 : index
    %c0_0 = arith.constant 0 : index
    %0 = vector.load %arg4[%c0, %c0_0] : memref<128x512xf32, #tpu.memory_space<vmem>>, vector<128x512xf32>
    %c0_1 = arith.constant 0 : index
    %c0_2 = arith.constant 0 : index
    %1 = vector.load %arg2[%c0_1, %c0_2] : memref<8x128xf32, #tpu.memory_space<vmem>>, vector<8x128xf32>
    %cst = arith.constant dense<0.000000e+00> : vector<8x512xf32>
    %2 = tpu.matmul %1, %0, %cst {dimension_numbers = #tpu.dot_dimension_numbers<[1], [0], [0], [1], [0, 0, 1, 1], [], []>} : vector<8x128xf32>, vector<128x512xf32>, vector<8x512xf32> -> vector<8x512xf32>
    %cst_3 = arith.constant 0.000000e+00 : f32
    %3 = vector.broadcast %cst_3 : f32 to vector<8x512xf32>
    %4 = arith.maximumf %2, %3 : vector<8x512xf32>
    %c0_4 = arith.constant 0 : index
    %c0_5 = arith.constant 0 : index
    %5 = vector.load %arg3[%c0_4, %c0_5] : memref<8x128xf32, #tpu.memory_space<vmem>>, vector<8x128xf32>
    %cst_6 = arith.constant dense<0.000000e+00> : vector<8x512xf32>
    %6 = tpu.matmul %5, %0, %cst_6 {dimension_numbers = #tpu.dot_dimension_numbers<[1], [0], [0], [1], [0, 0, 1, 1], [], []>} : vector<8x128xf32>, vector<128x512xf32>, vector<8x512xf32> -> vector<8x512xf32>
    %cst_7 = arith.constant 0.000000e+00 : f32
    %7 = vector.broadcast %cst_7 : f32 to vector<8x512xf32>
    %8 = arith.maximumf %6, %7 : vector<8x512xf32>
    %9 = arith.addf %4, %8 : vector<8x512xf32>
    %c0_8 = arith.constant 0 : index
    %c0_9 = arith.constant 0 : index
    %10 = vector.load %arg5[%c0_8, %c0_9] : memref<512x4xf32, #tpu.memory_space<vmem>>, vector<512x4xf32>
    %cst_10 = arith.constant dense<0.000000e+00> : vector<8x4xf32>
    %11 = tpu.matmul %9, %10, %cst_10 {dimension_numbers = #tpu.dot_dimension_numbers<[1], [0], [0], [1], [0, 0, 1, 1], [], []>} : vector<8x512xf32>, vector<512x4xf32>, vector<8x4xf32> -> vector<8x4xf32>
    %c0_i32 = arith.constant 0 : i32
    %12 = arith.cmpi eq, %arg1, %c0_i32 : i32
    %13 = arith.extui %12 : i1 to i32
    %c0_i32_11 = arith.constant 0 : i32
    %14 = arith.cmpi ne, %13, %c0_i32_11 : i32
    scf.if %14 {
      %c0_14 = arith.constant 0 : index
      %c0_15 = arith.constant 0 : index
      %18 = vector.load %arg6[%c0_14, %c0_15] : memref<1x4xf32, #tpu.memory_space<vmem>>, vector<1x4xf32>
      %19 = vector.broadcast %18 : vector<1x4xf32> to vector<8x4xf32>
      %20 = arith.addf %11, %19 : vector<8x4xf32>
      %c0_16 = arith.constant 0 : index
      %c0_17 = arith.constant 0 : index
      %21 = vector.load %arg7[%c0_16, %c0_17] : memref<8x4xf32, #tpu.memory_space<vmem>>, vector<8x4xf32>
      tpu.vector_store %arg7[%c0_16, %c0_17], %20 {strides = array<i32>} : memref<8x4xf32, #tpu.memory_space<vmem>>, vector<8x4xf32>,
    } else {
    }
    %c0_i32_12 = arith.constant 0 : i32
    %15 = arith.cmpi sgt, %arg1, %c0_i32_12 : i32
    %16 = arith.extui %15 : i1 to i32
    %c0_i32_13 = arith.constant 0 : i32
    %17 = arith.cmpi ne, %16, %c0_i32_13 : i32
    scf.if %17 {
      %c0_14 = arith.constant 0 : index
      %c0_15 = arith.constant 0 : index
      %18 = vector.load %arg7[%c0_14, %c0_15] : memref<8x4xf32, #tpu.memory_space<vmem>>, vector<8x4xf32>
      %19 = arith.addf %18, %11 : vector<8x4xf32>
      %c0_16 = arith.constant 0 : index
      %c0_17 = arith.constant 0 : index
      %20 = vector.load %arg7[%c0_16, %c0_17] : memref<8x4xf32, #tpu.memory_space<vmem>>, vector<8x4xf32>
      tpu.vector_store %arg7[%c0_16, %c0_17], %19 {strides = array<i32>} : memref<8x4xf32, #tpu.memory_space<vmem>>, vector<8x4xf32>,
    } else {
    }
    return
  }
  func.func @transform_0(%arg0: i32, %arg1: i32) -> (i32, i32) {
    %c0_i32 = arith.constant 0 : i32
    %c0_i32_0 = arith.constant 0 : i32
    return %arg0, %c0_i32 : i32, i32
  }
  func.func @transform_1(%arg0: i32, %arg1: i32) -> (i32, i32) {
    %c0_i32 = arith.constant 0 : i32
    %c0_i32_0 = arith.constant 0 : i32
    return %arg0, %c0_i32 : i32, i32
  }
  func.func @transform_2(%arg0: i32, %arg1: i32) -> (i32, i32) {
    %c0_i32 = arith.constant 0 : i32
    %c0_i32_0 = arith.constant 0 : i32
    return %c0_i32, %arg1 : i32, i32
  }
  func.func @transform_3(%arg0: i32, %arg1: i32) -> (i32, i32) {
    %c0_i32 = arith.constant 0 : i32
    %c0_i32_0 = arith.constant 0 : i32
    return %arg1, %c0_i32 : i32, i32
  }
  func.func @transform_4(%arg0: i32, %arg1: i32) -> (i32, i32) {
    %c0_i32 = arith.constant 0 : i32
    %c0_i32_0 = arith.constant 0 : i32
    %c0_i32_1 = arith.constant 0 : i32
    return %c0_i32, %c0_i32_0 : i32, i32
  }
  func.func @transform_5(%arg0: i32, %arg1: i32) -> (i32, i32) {
    %c0_i32 = arith.constant 0 : i32
    %c0_i32_0 = arith.constant 0 : i32
    return %arg0, %c0_i32 : i32, i32
  }
}

</mosaic_0001>

<bundles_post_ra>
// kernel: _ensemble_forward_impl.1
= control target key start
LH: loop header
LB: loop body
LE: loop exit
PB: predicated region body
PF: predicated region fallthrough
CT: control target
= control target key end

     0   :  { %v1377_v3 = vmov 0.0   ;;  %vm598_vm0 = vcmask 31744   ;;  %s1371_s2 = inlined_call_operand.vmem [shape: f32[128,512], index: 2, kind: input, shape index: {}]   ;;  %s1372_s0 = inlined_call_operand.vmem [shape: f32[8,128], index: 0, kind: input, shape index: {}]   ;;  %s1373_s1 = inlined_call_operand.vmem [shape: f32[8,128], index: 1, kind: input, shape index: {}]   ;;  %s1374_s3 = inlined_call_operand.vmem [shape: f32[512,4], index: 3, kind: input, shape index: {}]   ;;  %s1375_s4 = inlined_call_operand.vmem [shape: f32[1,4], index: 4, kind: input, shape index: {}]   ;;  %s1376_s5 = inlined_call_operand.vmem [shape: f32[8,4], index: 5, kind: output, shape index: {}]  }
   0x1   :  { %v718_v0 = vld [vmem:[%s1371_s2 + $0x1e8] sm:$0xff]  ;;  %v723_v1 = vld [vmem:[%s1371_s2 + $0x1f8] sm:$0xff]  ;;  %v728_v2 = vld [vmem:[%s1371_s2 + $0x1e0] sm:$0xff]  ;;  %149 = vmatprep.mubr.f32.mxu0 %v1377_v3  ;;  %220 = vmatprep.mubr.f32.mxu1 %v1377_v3 }
   0x2   :  { %85 = vmatprep.subr.mxu0 %v718_v0  ;;  %156 = vmatprep.subr.mxu1 %v723_v1  ;;  %v737_v4 = vld [vmem:[%s1371_s2 + $0x1f0] sm:$0xff]  ;;  %v742_v5 = vld [vmem:[%s1371_s2 + $0x1c8] sm:$0xff]  ;;  %v747_v6 = vld [vmem:[%s1371_s2 + $0x1d8] sm:$0xff] }
   0x3   :  { %86 = vmatpush1.msra.mxu0 %v728_v2  ;;  %157 = vmatpush1.msra.mxu1 %v737_v4  ;;  %v754_v7 = vld [vmem:[%s1371_s2 + $0x1c0] sm:$0xff]  ;;  %v759_v8 = vld [vmem:[%s1371_s2 + $0x1d0] sm:$0xff]  ;;  %v764_v9 = vld [vmem:[%s1371_s2 + $0x1a8] sm:$0xff] }
   0x4   :  { %87 = vmatprep.subr.mxu0 %v742_v5  ;;  %158 = vmatprep.subr.mxu1 %v747_v6  ;;  %v771_v10 = vld [vmem:[%s1371_s2 + $0x1b8] sm:$0xff]  ;;  %v776_v11 = vld [vmem:[%s1371_s2 + $0x1a0] sm:$0xff]  ;;  %v781_v12 = vld [vmem:[%s1371_s2 + $0x1b0] sm:$0xff] }
   0x5   :  { %88 = vmatpush1.msra.mxu0 %v754_v7  ;;  %159 = vmatpush1.msra.mxu1 %v759_v8  ;;  %v788_v13 = vld [vmem:[%s1371_s2 + $0x188] sm:$0xff]  ;;  %v793_v14 = vld [vmem:[%s1371_s2 + $0x198] sm:$0xff]  ;;  %v800_v15 = vld [vmem:[%s1371_s2 + $0x180] sm:$0xff] }
   0x6   :  { %89 = vmatprep.subr.mxu0 %v764_v9  ;;  %160 = vmatprep.subr.mxu1 %v771_v10  ;;  %v805_v16 = vld [vmem:[%s1371_s2 + $0x190] sm:$0xff]  ;;  %v812_v17 = vld [vmem:[%s1371_s2 + $0x168] sm:$0xff]  ;;  %v817_v18 = vld [vmem:[%s1371_s2 + $0x178] sm:$0xff] }
   0x7   :  { %90 = vmatpush1.msra.mxu0 %v776_v11  ;;  %161 = vmatpush1.msra.mxu1 %v781_v12  ;;  %v824_v19 = vld [vmem:[%s1371_s2 + $0x160] sm:$0xff]  ;;  %v829_v20 = vld [vmem:[%s1371_s2 + $0x170] sm:$0xff]  ;;  %v836_v21 = vld [vmem:[%s1371_s2 + $0x148] sm:$0xff] }
   0x8   :  { %91 = vmatprep.subr.mxu0 %v788_v13  ;;  %162 = vmatprep.subr.mxu1 %v793_v14  ;;  %v841_v22 = vld [vmem:[%s1371_s2 + $0x158] sm:$0xff]  ;;  %v848_v23 = vld [vmem:[%s1371_s2 + $0x140] sm:$0xff]  ;;  %v853_v24 = vld [vmem:[%s1371_s2 + $0x150] sm:$0xff] }
   0x9   :  { %92 = vmatpush1.msra.mxu0 %v800_v15  ;;  %163 = vmatpush1.msra.mxu1 %v805_v16  ;;  %v860_v25 = vld [vmem:[%s1371_s2 + $0x128] sm:$0xff]  ;;  %v865_v26 = vld [vmem:[%s1371_s2 + $0x138] sm:$0xff]  ;;  %v872_v27 = vld [vmem:[%s1371_s2 + $0x120] sm:$0xff] }
   0xa   :  { %93 = vmatprep.subr.mxu0 %v812_v17  ;;  %164 = vmatprep.subr.mxu1 %v817_v18  ;;  %v877_v28 = vld [vmem:[%s1371_s2 + $0x130] sm:$0xff]  ;;  %v884_v29 = vld [vmem:[%s1371_s2 + $0x108] sm:$0xff]  ;;  %v889_v30 = vld [vmem:[%s1371_s2 + $0x118] sm:$0xff] }
   0xb   :  { %94 = vmatpush1.msra.mxu0 %v824_v19  ;;  %165 = vmatpush1.msra.mxu1 %v829_v20  ;;  %v896_v31 = vld [vmem:[%s1371_s2 + $0x100] sm:$0xff]  ;;  %v901_v32 = vld [vmem:[%s1371_s2 + $0x110] sm:$0xff]  ;;  %v908_v33 = vld [vmem:[%s1371_s2 + $0xe8] sm:$0xff] }
   0xc   :  { %95 = vmatprep.subr.mxu0 %v836_v21  ;;  %166 = vmatprep.subr.mxu1 %v841_v22  ;;  %v913_v34 = vld [vmem:[%s1371_s2 + $0xf8] sm:$0xff]  ;;  %v920_v35 = vld [vmem:[%s1371_s2 + $0xe0] sm:$0xff]  ;;  %v925_v36 = vld [vmem:[%s1371_s2 + $0xf0] sm:$0xff] }
   0xd   :  { %96 = vmatpush1.msra.mxu0 %v848_v23  ;;  %167 = vmatpush1.msra.mxu1 %v853_v24  ;;  %v932_v37 = vld [vmem:[%s1371_s2 + $0xc8] sm:$0xff]  ;;  %v937_v38 = vld [vmem:[%s1371_s2 + $0xd8] sm:$0xff]  ;;  %v944_v39 = vld [vmem:[%s1371_s2 + $0xc0] sm:$0xff] }
   0xe   :  { %97 = vmatprep.subr.mxu0 %v860_v25  ;;  %168 = vmatprep.subr.mxu1 %v865_v26  ;;  %v949_v40 = vld [vmem:[%s1371_s2 + $0xd0] sm:$0xff]  ;;  %v956_v41 = vld [vmem:[%s1371_s2 + $0xa8] sm:$0xff]  ;;  %v961_v42 = vld [vmem:[%s1371_s2 + $0xb8] sm:$0xff] }
   0xf   :  { %98 = vmatpush1.msra.mxu0 %v872_v27  ;;  %169 = vmatpush1.msra.mxu1 %v877_v28  ;;  %v968_v43 = vld [vmem:[%s1371_s2 + $0xa0] sm:$0xff]  ;;  %v973_v44 = vld [vmem:[%s1371_s2 + $0xb0] sm:$0xff]  ;;  %v980_v45 = vld [vmem:[%s1371_s2 + $0x88] sm:$0xff] }
  0x10   :  { %99 = vmatprep.subr.mxu0 %v884_v29  ;;  %170 = vmatprep.subr.mxu1 %v889_v30  ;;  %v985_v46 = vld [vmem:[%s1371_s2 + $0x98] sm:$0xff]  ;;  %v992_v47 = vld [vmem:[%s1371_s2 + $0x80] sm:$0xff]  ;;  %v997_v48 = vld [vmem:[%s1371_s2 + $0x90] sm:$0xff] }
  0x11   :  { %100 = vmatpush1.msra.mxu0 %v896_v31  ;;  %171 = vmatpush1.msra.mxu1 %v901_v32  ;;  %v1004_v49 = vld [vmem:[%s1371_s2 + $0x68] sm:$0xff]  ;;  %v1009_v50 = vld [vmem:[%s1371_s2 + $0x78] sm:$0xff]  ;;  %v1016_v51 = vld [vmem:[%s1371_s2 + $0x60] sm:$0xff] }
  0x12   :  { %101 = vmatprep.subr.mxu0 %v908_v33  ;;  %172 = vmatprep.subr.mxu1 %v913_v34  ;;  %v1021_v52 = vld [vmem:[%s1371_s2 + $0x70] sm:$0xff]  ;;  %v1028_v53 = vld [vmem:[%s1371_s2 + $0x48] sm:$0xff]  ;;  %v1033_v54 = vld [vmem:[%s1371_s2 + $0x58] sm:$0xff] }
  0x13   :  { %102 = vmatpush1.msra.mxu0 %v920_v35  ;;  %173 = vmatpush1.msra.mxu1 %v925_v36  ;;  %v1040_v55 = vld [vmem:[%s1371_s2 + $0x40] sm:$0xff]  ;;  %v1045_v56 = vld [vmem:[%s1371_s2 + $0x50] sm:$0xff]  ;;  %v1052_v57 = vld [vmem:[%s1371_s2 + $0x28] sm:$0xff] }
  0x14   :  { %103 = vmatprep.subr.mxu0 %v932_v37  ;;  %174 = vmatprep.subr.mxu1 %v937_v38  ;;  %1380 = vst [vmem:[#allocation2_spill] sm:$0xff] %v1052_v57  ;;  %v1057_v58 = vld [vmem:[%s1371_s2 + $0x38] sm:$0xff]  ;;  %v1064_v59 = vld [vmem:[%s1371_s2 + $0x20] sm:$0xff]  ;;  %v1069_v60 = vld [vmem:[%s1371_s2 + $0x30] sm:$0xff] }
  0x15   :  { %104 = vmatpush1.msra.mxu0 %v944_v39  ;;  %175 = vmatpush1.msra.mxu1 %v949_v40  ;;  %v1076_v61 = vld [vmem:[%s1371_s2 + $0x8] sm:$0xff]  ;;  %v1081_v62 = vld [vmem:[%s1371_s2 + $0x18] sm:$0xff]  ;;  %v1088_v63 = vld [vmem:[%s1371_s2] sm:$0xff] }
  0x16   :  { %105 = vmatprep.subr.mxu0 %v956_v41  ;;  %176 = vmatprep.subr.mxu1 %v961_v42  ;;  %v1093_v3 = vld [vmem:[%s1371_s2 + $0x10] sm:$0xff] }
  0x17   :  { %106 = vmatpush1.msra.mxu0 %v968_v43  ;;  %177 = vmatpush1.msra.mxu1 %v973_v44 }
  0x18   :  { %107 = vmatprep.subr.mxu0 %v980_v45  ;;  %178 = vmatprep.subr.mxu1 %v985_v46 }
  0x19   :  { %108 = vmatpush1.msra.mxu0 %v992_v47  ;;  %179 = vmatpush1.msra.mxu1 %v997_v48 }
  0x1a   :  { %109 = vmatprep.subr.mxu0 %v1004_v49  ;;  %180 = vmatprep.subr.mxu1 %v1009_v50 }
  0x1b   :  { %110 = vmatpush1.msra.mxu0 %v1016_v51  ;;  %181 = vmatpush1.msra.mxu1 %v1021_v52 }
  0x1c   :  { %111 = vmatprep.subr.mxu0 %v1028_v53  ;;  %182 = vmatprep.subr.mxu1 %v1033_v54 }
  0x1d   :  { %112 = vmatpush1.msra.mxu0 %v1040_v55  ;;  %183 = vmatpush1.msra.mxu1 %v1045_v56 }
  0x1e   :  { %113 = vmatprep.subr.mxu0 %v1052_v57  ;;  %184 = vmatprep.subr.mxu1 %v1057_v58  ;;  %v84_v57 = vld [vmem:[%s1372_s0] sm:$0xff] }
  0x1f   :  { %114 = vmatpush1.msra.mxu0 %v1064_v59  ;;  %185 = vmatpush1.msra.mxu1 %v1069_v60 }
  0x20   :  { %115 = vmatprep.subr.mxu0 %v1076_v61  ;;  %186 = vmatprep.subr.mxu1 %v1081_v62 }
  0x21   :  { %116 = vmatpush1.msra.mxu0 %v1088_v63  ;;  %187 = vmatpush1.msra.mxu1 %v1093_v3 }
  0x22   :  { %150 = vmatmul.mubr.f32.vlgmr.msra.gmra.mxu0 %v84_v57  ;;  %221 = vmatmul.mubr.f32.vlgmr.msra.gmra.mxu1 %v84_v57  ;;  %v384_v57 = vld [vmem:[%s1374_s3 + $0x10] sm:$0xff] }
  0x23   :  { %232 = vmatprep.subr.mxu0 %v718_v0  ;;  %303 = vmatprep.subr.mxu1 %v723_v1  ;;  %v1381_v0 = vld [vmem:[#allocation2_spill] sm:$0xff] }
  0x24   :  { %233 = vmatpush1.msra.mxu0 %v728_v2  ;;  %304 = vmatpush1.msra.mxu1 %v737_v4  ;;  %v231_v1 = vld [vmem:[%s1373_s1] sm:$0xff]  ;;  %v1382_v2 = vmov 0.0   ;;  %v413_v4 = vld [vmem:[%s1374_s3 + $0xf8] sm:$0xff] }
  0x25   :  { %234 = vmatprep.subr.mxu0 %v742_v5  ;;  %305 = vmatprep.subr.mxu1 %v747_v6  ;;  %v445_v5 = vld [vmem:[%s1374_s3 + $0x1f8] sm:$0xff] }
  0x26   :  { %235 = vmatpush1.msra.mxu0 %v754_v7  ;;  %306 = vmatpush1.msra.mxu1 %v759_v8  ;;  %v397_v6 = vld [vmem:[%s1374_s3 + $0x78] sm:$0xff]  ;;  %v412_v7 = vld [vmem:[%s1374_s3 + $0xf0] sm:$0xff] }
  0x27   :  { %236 = vmatprep.subr.mxu0 %v764_v9  ;;  %307 = vmatprep.subr.mxu1 %v771_v10  ;;  %v444_v8 = vld [vmem:[%s1374_s3 + $0x1f0] sm:$0xff] }
  0x28   :  { %237 = vmatpush1.msra.mxu0 %v776_v11  ;;  %308 = vmatpush1.msra.mxu1 %v781_v12  ;;  %v396_v9 = vld [vmem:[%s1374_s3 + $0x70] sm:$0xff]  ;;  %v411_v11 = vld [vmem:[%s1374_s3 + $0xe8] sm:$0xff] }
  0x29   :  { %238 = vmatprep.subr.mxu0 %v788_v13  ;;  %309 = vmatprep.subr.mxu1 %v793_v14  ;;  %v428_v10 = vld [vmem:[%s1374_s3 + $0x170] sm:$0xff]  ;;  %v443_v12 = vld [vmem:[%s1374_s3 + $0x1e8] sm:$0xff] }
  0x2a   :  { %239 = vmatpush1.msra.mxu0 %v800_v15  ;;  %310 = vmatpush1.msra.mxu1 %v805_v16  ;;  %v395_v13 = vld [vmem:[%s1374_s3 + $0x68] sm:$0xff]  ;;  %v410_v15 = vld [vmem:[%s1374_s3 + $0xe0] sm:$0xff] }
  0x2b   :  { %240 = vmatprep.subr.mxu0 %v812_v17  ;;  %311 = vmatprep.subr.mxu1 %v817_v18  ;;  %v427_v14 = vld [vmem:[%s1374_s3 + $0x168] sm:$0xff]  ;;  %v442_v16 = vld [vmem:[%s1374_s3 + $0x1e0] sm:$0xff] }
  0x2c   :  { %241 = vmatpush1.msra.mxu0 %v824_v19  ;;  %312 = vmatpush1.msra.mxu1 %v829_v20  ;;  %v394_v17 = vld [vmem:[%s1374_s3 + $0x60] sm:$0xff]  ;;  %v409_v19 = vld [vmem:[%s1374_s3 + $0xd8] sm:$0xff] }
  0x2d   :  { %242 = vmatprep.subr.mxu0 %v836_v21  ;;  %313 = vmatprep.subr.mxu1 %v841_v22  ;;  %v426_v18 = vld [vmem:[%s1374_s3 + $0x160] sm:$0xff]  ;;  %v441_v20 = vld [vmem:[%s1374_s3 + $0x1d8] sm:$0xff] }
  0x2e   :  { %243 = vmatpush1.msra.mxu0 %v848_v23  ;;  %314 = vmatpush1.msra.mxu1 %v853_v24  ;;  %v393_v21 = vld [vmem:[%s1374_s3 + $0x58] sm:$0xff]  ;;  %v408_v23 = vld [vmem:[%s1374_s3 + $0xd0] sm:$0xff] }
  0x2f   :  { %244 = vmatprep.subr.mxu0 %v860_v25  ;;  %315 = vmatprep.subr.mxu1 %v865_v26  ;;  %v425_v22 = vld [vmem:[%s1374_s3 + $0x158] sm:$0xff]  ;;  %v440_v24 = vld [vmem:[%s1374_s3 + $0x1d0] sm:$0xff] }
  0x30   :  { %245 = vmatpush1.msra.mxu0 %v872_v27  ;;  %316 = vmatpush1.msra.mxu1 %v877_v28  ;;  %v392_v25 = vld [vmem:[%s1374_s3 + $0x50] sm:$0xff]  ;;  %v407_v27 = vld [vmem:[%s1374_s3 + $0xc8] sm:$0xff] }
  0x31   :  { %246 = vmatprep.subr.mxu0 %v884_v29  ;;  %317 = vmatprep.subr.mxu1 %v889_v30  ;;  %v424_v26 = vld [vmem:[%s1374_s3 + $0x150] sm:$0xff]  ;;  %v439_v28 = vld [vmem:[%s1374_s3 + $0x1c8] sm:$0xff] }
  0x32   :  { %247 = vmatpush1.msra.mxu0 %v896_v31  ;;  %318 = vmatpush1.msra.mxu1 %v901_v32  ;;  %v391_v29 = vld [vmem:[%s1374_s3 + $0x48] sm:$0xff]  ;;  %v406_v31 = vld [vmem:[%s1374_s3 + $0xc0] sm:$0xff] }
  0x33   :  { %248 = vmatprep.subr.mxu0 %v908_v33  ;;  %319 = vmatprep.subr.mxu1 %v913_v34  ;;  %v423_v30 = vld [vmem:[%s1374_s3 + $0x148] sm:$0xff]  ;;  %v438_v32 = vld [vmem:[%s1374_s3 + $0x1c0] sm:$0xff] }
  0x34   :  { %249 = vmatpush1.msra.mxu0 %v920_v35  ;;  %320 = vmatpush1.msra.mxu1 %v925_v36  ;;  %v390_v33 = vld [vmem:[%s1374_s3 + $0x40] sm:$0xff]  ;;  %v405_v35 = vld [vmem:[%s1374_s3 + $0xb8] sm:$0xff] }
  0x35   :  { %250 = vmatprep.subr.mxu0 %v932_v37  ;;  %321 = vmatprep.subr.mxu1 %v937_v38  ;;  %v422_v34 = vld [vmem:[%s1374_s3 + $0x140] sm:$0xff]  ;;  %v437_v36 = vld [vmem:[%s1374_s3 + $0x1b8] sm:$0xff] }
  0x36   :  { %251 = vmatpush1.msra.mxu0 %v944_v39  ;;  %322 = vmatpush1.msra.mxu1 %v949_v40  ;;  %v389_v37 = vld [vmem:[%s1374_s3 + $0x38] sm:$0xff]  ;;  %v404_v39 = vld [vmem:[%s1374_s3 + $0xb0] sm:$0xff] }
  0x37   :  { %252 = vmatprep.subr.mxu0 %v956_v41  ;;  %323 = vmatprep.subr.mxu1 %v961_v42  ;;  %v421_v38 = vld [vmem:[%s1374_s3 + $0x138] sm:$0xff]  ;;  %v436_v40 = vld [vmem:[%s1374_s3 + $0x1b0] sm:$0xff] }
  0x38   :  { %253 = vmatpush1.msra.mxu0 %v968_v43  ;;  %324 = vmatpush1.msra.mxu1 %v973_v44  ;;  %v388_v41 = vld [vmem:[%s1374_s3 + $0x30] sm:$0xff]  ;;  %v403_v43 = vld [vmem:[%s1374_s3 + $0xa8] sm:$0xff] }
  0x39   :  { %254 = vmatprep.subr.mxu0 %v980_v45  ;;  %325 = vmatprep.subr.mxu1 %v985_v46  ;;  %v420_v42 = vld [vmem:[%s1374_s3 + $0x130] sm:$0xff]  ;;  %v435_v44 = vld [vmem:[%s1374_s3 + $0x1a8] sm:$0xff] }
  0x3a   :  { %255 = vmatpush1.msra.mxu0 %v992_v47  ;;  %326 = vmatpush1.msra.mxu1 %v997_v48  ;;  %v387_v45 = vld [vmem:[%s1374_s3 + $0x28] sm:$0xff]  ;;  %v402_v47 = vld [vmem:[%s1374_s3 + $0xa0] sm:$0xff] }
  0x3b   :  { %256 = vmatprep.subr.mxu0 %v1004_v49  ;;  %327 = vmatprep.subr.mxu1 %v1009_v50  ;;  %v419_v46 = vld [vmem:[%s1374_s3 + $0x128] sm:$0xff]  ;;  %v434_v48 = vld [vmem:[%s1374_s3 + $0x1a0] sm:$0xff] }
  0x3c   :  { %257 = vmatpush1.msra.mxu0 %v1016_v51  ;;  %328 = vmatpush1.msra.mxu1 %v1021_v52  ;;  %v386_v49 = vld [vmem:[%s1374_s3 + $0x20] sm:$0xff]  ;;  %v401_v51 = vld [vmem:[%s1374_s3 + $0x98] sm:$0xff] }
  0x3d   :  { %258 = vmatprep.subr.mxu0 %v1028_v53  ;;  %329 = vmatprep.subr.mxu1 %v1033_v54  ;;  %v418_v50 = vld [vmem:[%s1374_s3 + $0x120] sm:$0xff]  ;;  %v433_v52 = vld [vmem:[%s1374_s3 + $0x198] sm:$0xff] }
  0x3e   :  { %259 = vmatpush1.msra.mxu0 %v1040_v55  ;;  %330 = vmatpush1.msra.mxu1 %v1045_v56  ;;  %v385_v53 = vld [vmem:[%s1374_s3 + $0x18] sm:$0xff]  ;;  %v400_v55 = vld [vmem:[%s1374_s3 + $0x90] sm:$0xff] }
  0x3f   :  { %260 = vmatprep.subr.mxu0 %v1381_v0  ;;  %331 = vmatprep.subr.mxu1 %v1057_v58  ;;  %v417_v54 = vld [vmem:[%s1374_s3 + $0x118] sm:$0xff]  ;;  %v432_v56 = vld [vmem:[%s1374_s3 + $0x190] sm:$0xff]  ;;  %v430_v0 = vld [vmem:[%s1374_s3 + $0x180] sm:$0xff] }
  0x40   :  { %261 = vmatpush1.msra.mxu0 %v1064_v59  ;;  %332 = vmatpush1.msra.mxu1 %v1069_v60  ;;  %v416_v58 = vld [vmem:[%s1374_s3 + $0x110] sm:$0xff]  ;;  %v399_v59 = vld [vmem:[%s1374_s3 + $0x88] sm:$0xff] }
  0x41   :  { %262 = vmatprep.subr.mxu0 %v1076_v61  ;;  %333 = vmatprep.subr.mxu1 %v1081_v62  ;;  %v431_v60 = vld [vmem:[%s1374_s3 + $0x188] sm:$0xff] }
  0x42   :  { %263 = vmatpush1.msra.mxu0 %v1088_v63  ;;  %296 = vmatprep.mubr.f32.mxu0 %v1382_v2  ;;  %v383_v61 = vld [vmem:[%s1374_s3 + $0x8] sm:$0xff]  ;;  %v398_v63 = vld [vmem:[%s1374_s3 + $0x80] sm:$0xff] }
  0x43   :  { %334 = vmatpush1.msra.mxu1 %v1093_v3  ;;  %367 = vmatprep.mubr.f32.mxu1 %v1382_v2  ;;  %v429_v3 = vld [vmem:[%s1374_s3 + $0x178] sm:$0xff]  ;;  %v415_v62 = vld [vmem:[%s1374_s3 + $0x108] sm:$0xff]  ;;  %v414_v2 = vld [vmem:[%s1374_s3 + $0x100] sm:$0xff] }
  0x44   :  { %297 = vmatmul.mubr.f32.vlgmr.msra.gmra.mxu0 %v231_v1  ;;  %368 = vmatmul.mubr.f32.vlgmr.msra.gmra.mxu1 %v231_v1  ;;  %v382_v1 = vld [vmem:[%s1374_s3] sm:$0xff] }
  0x45   :  { %613 = vmatprep.subr.mxu0 %v413_v4  ;;  %648 = vmatprep.subr.mxu1 %v445_v5 }
  0x46   :  { %614 = vmatpush3.msra.mxu0 %v397_v6  ;;  %649 = vmatpush3.msra.mxu1 %v429_v3 }
  0x47   :  { %615 = vmatprep.subr.mxu0 %v412_v7  ;;  %650 = vmatprep.subr.mxu1 %v444_v8 }
  0x48   :  { %616 = vmatpush3.msra.mxu0 %v396_v9  ;;  %651 = vmatpush3.msra.mxu1 %v428_v10 }
  0x49   :  { %617 = vmatprep.subr.mxu0 %v411_v11  ;;  %652 = vmatprep.subr.mxu1 %v443_v12 }
  0x4a   :  { %618 = vmatpush3.msra.mxu0 %v395_v13  ;;  %653 = vmatpush3.msra.mxu1 %v427_v14 }
  0x4b   :  { %619 = vmatprep.subr.mxu0 %v410_v15  ;;  %654 = vmatprep.subr.mxu1 %v442_v16 }
  0x4c   :  { %620 = vmatpush3.msra.mxu0 %v394_v17  ;;  %655 = vmatpush3.msra.mxu1 %v426_v18 }
  0x4d   :  { %621 = vmatprep.subr.mxu0 %v409_v19  ;;  %656 = vmatprep.subr.mxu1 %v441_v20 }
  0x4e   :  { %622 = vmatpush3.msra.mxu0 %v393_v21  ;;  %657 = vmatpush3.msra.mxu1 %v425_v22 }
  0x4f   :  { %623 = vmatprep.subr.mxu0 %v408_v23  ;;  %658 = vmatprep.subr.mxu1 %v440_v24 }
  0x50   :  { %624 = vmatpush3.msra.mxu0 %v392_v25  ;;  %659 = vmatpush3.msra.mxu1 %v424_v26 }
  0x51   :  { %625 = vmatprep.subr.mxu0 %v407_v27  ;;  %660 = vmatprep.subr.mxu1 %v439_v28 }
  0x52   :  { %626 = vmatpush3.msra.mxu0 %v391_v29  ;;  %661 = vmatpush3.msra.mxu1 %v423_v30  ;;  %v612_v29 = vld [vmem:[%s1375_s4] ss:$0 sm:$0xff] }
  0x53   :  { %627 = vmatprep.subr.mxu0 %v406_v31  ;;  %662 = vmatprep.subr.mxu1 %v438_v32 }
  0x54   :  { %628 = vmatpush3.msra.mxu0 %v390_v33  ;;  %663 = vmatpush3.msra.mxu1 %v422_v34 }
  0x55   :  { %629 = vmatprep.subr.mxu0 %v405_v35  ;;  %664 = vmatprep.subr.mxu1 %v437_v36 }
  0x56   :  { %630 = vmatpush3.msra.mxu0 %v389_v37  ;;  %665 = vmatpush3.msra.mxu1 %v421_v38 }
  0x57   :  { %631 = vmatprep.subr.mxu0 %v404_v39  ;;  %666 = vmatprep.subr.mxu1 %v436_v40 }
  0x58   :  { %632 = vmatpush3.msra.mxu0 %v388_v41  ;;  %667 = vmatpush3.msra.mxu1 %v420_v42 }
  0x59   :  { %633 = vmatprep.subr.mxu0 %v403_v43  ;;  %668 = vmatprep.subr.mxu1 %v435_v44 }
  0x5a   :  { %634 = vmatpush3.msra.mxu0 %v387_v45  ;;  %669 = vmatpush3.msra.mxu1 %v419_v46 }
  0x5b   :  { %635 = vmatprep.subr.mxu0 %v402_v47  ;;  %670 = vmatprep.subr.mxu1 %v434_v48 }
  0x5c   :  { %636 = vmatpush3.msra.mxu0 %v386_v49  ;;  %671 = vmatpush3.msra.mxu1 %v418_v50 }
  0x5d   :  { %637 = vmatprep.subr.mxu0 %v401_v51  ;;  %672 = vmatprep.subr.mxu1 %v433_v52 }
  0x5e   :  { %638 = vmatpush3.msra.mxu0 %v385_v53  ;;  %673 = vmatpush3.msra.mxu1 %v417_v54 }
  0x5f   :  { %639 = vmatprep.subr.mxu0 %v400_v55  ;;  %674 = vmatprep.subr.mxu1 %v432_v56 }
  0x60   :  { %640 = vmatpush3.msra.mxu0 %v384_v57  ;;  %675 = vmatpush3.msra.mxu1 %v416_v58 }
  0x61   :  { %641 = vmatprep.subr.mxu0 %v399_v59  ;;  %676 = vmatprep.subr.mxu1 %v431_v60 }
  0x62   :  { %642 = vmatpush3.msra.mxu0 %v383_v61  ;;  %677 = vmatpush3.msra.mxu1 %v415_v62 }
  0x63   :  { %643 = vmatprep.subr.mxu0 %v398_v63  ;;  %678 = vmatprep.subr.mxu1 %v430_v0 }
  0x64   :  { %644 = vmatpush3.msra.mxu0 %v382_v1  ;;  %679 = vmatpush3.msra.mxu1 %v414_v2 }
  0xe2   :  { %v151_v4 = vpop.f32.mrf.mxu0  ;;  %v222_v5 = vpop.f32.mrf.mxu1 }
  0xe3   :  { %v227_v17 = vmax.f32 %v151_v4, 0.0  ;;  %v229_v18 = vmax.f32 %v222_v5, 0.0 }
  0xe4   :  { %v153_v6 = vpop.f32.mrf.mxu0  ;;  %v224_v3 = vpop.f32.mrf.mxu1 }
  0xe5   :  { %v228_v13 = vmax.f32 %v153_v6, 0.0  ;;  %v230_v14 = vmax.f32 %v224_v3, 0.0 }
 0x104   :  { %v298_v7 = vpop.f32.mrf.mxu0  ;;  %v369_v8 = vpop.f32.mrf.mxu1 }
 0x105   :  { %v374_v9 = vmax.f32 %v298_v7, 0.0  ;;  %v376_v10 = vmax.f32 %v369_v8, 0.0 }
 0x106   :  { %v300_v11 = vpop.f32.mrf.mxu0  ;;  %v371_v12 = vpop.f32.mrf.mxu1 }
 0x107   :  { %v375_v15 = vmax.f32 %v300_v11, 0.0  ;;  %v377_v16 = vmax.f32 %v371_v12, 0.0  ;;  %v378_v21 = vadd.f32 %v374_v9, %v227_v17  ;;  %v380_v22 = vadd.f32 %v376_v10, %v229_v18 }
 0x109   :  { %v379_v19 = vadd.f32 %v375_v15, %v228_v13  ;;  %v381_v20 = vadd.f32 %v377_v16, %v230_v14 }
 0x10b   :  { %510 = vmatprep.mubr.f32.mxu0 %v379_v19  ;;  %580 = vmatprep.mubr.f32.mxu1 %v381_v20 }
 0x10c   :  { %511 = vmatmul.mubr.f32.vlgmr.msra.gmra.mxu0 %v378_v21  ;;  %581 = vmatmul.mubr.f32.vlgmr.msra.gmra.mxu1 %v380_v22 }
 0x1cc   :  { %v645_v23 = vpop.f32.mrf.mxu0  ;;  %v680_v24 = vpop.f32.mrf.mxu1 }
 0x1ce   :  { %v646_v25 = vpop.f32.mrf.mxu0  ;;  %v681_v26 = vpop.f32.mrf.mxu1 }
 0x1cf   :  { %v647_v27 = vadd.f32 %v646_v25, %v645_v23  ;;  %v682_v28 = vadd.f32 %v681_v26, %v680_v24 }
 0x1d1   :  { %v583_v30 = vadd.f32 %v682_v28, %v647_v27 }
 0x1d3   :  { %v597_v31 = vadd.f32 %v612_v29, %v583_v30 }
 0x1d5   :  { %599 = vst.msk [vmem:[%s1376_s5] sm:$0xff] %vm598_vm0, %v597_v31 }

// kernel: _ensemble_forward_impl.1
= control target key start
LH: loop header
LB: loop body
LE: loop exit
PB: predicated region body
PF: predicated region fallthrough
CT: control target
= control target key end

     0   :  { %v1377_v3 = vmov 0.0   ;;  %vm598_vm0 = vcmask 31744   ;;  %s1371_s2 = inlined_call_operand.vmem [shape: f32[128,512], index: 2, kind: input, shape index: {}]   ;;  %s1372_s0 = inlined_call_operand.vmem [shape: f32[8,128], index: 0, kind: input, shape index: {}]   ;;  %s1373_s1 = inlined_call_operand.vmem [shape: f32[8,128], index: 1, kind: input, shape index: {}]   ;;  %s1374_s3 = inlined_call_operand.vmem [shape: f32[512,4], index: 3, kind: input, shape index: {}]   ;;  %s1375_s4 = inlined_call_operand.vmem [shape: f32[1,4], index: 4, kind: input, shape index: {}]   ;;  %s1376_s5 = inlined_call_operand.vmem [shape: f32[8,4], index: 5, kind: output, shape index: {}]  }
   0x1   :  { %v718_v0 = vld [vmem:[%s1371_s2 + $0x1e8] sm:$0xff]  ;;  %v723_v1 = vld [vmem:[%s1371_s2 + $0x1f8] sm:$0xff]  ;;  %v728_v2 = vld [vmem:[%s1371_s2 + $0x1e0] sm:$0xff]  ;;  %149 = vmatprep.mubr.f32.mxu0 %v1377_v3  ;;  %220 = vmatprep.mubr.f32.mxu1 %v1377_v3 }
   0x2   :  { %85 = vmatprep.subr.mxu0 %v718_v0  ;;  %156 = vmatprep.subr.mxu1 %v723_v1  ;;  %v737_v4 = vld [vmem:[%s1371_s2 + $0x1f0] sm:$0xff]  ;;  %v742_v5 = vld [vmem:[%s1371_s2 + $0x1c8] sm:$0xff]  ;;  %v747_v6 = vld [vmem:[%s1371_s2 + $0x1d8] sm:$0xff] }
   0x3   :  { %86 = vmatpush1.msra.mxu0 %v728_v2  ;;  %157 = vmatpush1.msra.mxu1 %v737_v4  ;;  %v754_v7 = vld [vmem:[%s1371_s2 + $0x1c0] sm:$0xff]  ;;  %v759_v8 = vld [vmem:[%s1371_s2 + $0x1d0] sm:$0xff]  ;;  %v764_v9 = vld [vmem:[%s1371_s2 + $0x1a8] sm:$0xff] }
   0x4   :  { %87 = vmatprep.subr.mxu0 %v742_v5  ;;  %158 = vmatprep.subr.mxu1 %v747_v6  ;;  %v771_v10 = vld [vmem:[%s1371_s2 + $0x1b8] sm:$0xff]  ;;  %v776_v11 = vld [vmem:[%s1371_s2 + $0x1a0] sm:$0xff]  ;;  %v781_v12 = vld [vmem:[%s1371_s2 + $0x1b0] sm:$0xff] }
   0x5   :  { %88 = vmatpush1.msra.mxu0 %v754_v7  ;;  %159 = vmatpush1.msra.mxu1 %v759_v8  ;;  %v788_v13 = vld [vmem:[%s1371_s2 + $0x188] sm:$0xff]  ;;  %v793_v14 = vld [vmem:[%s1371_s2 + $0x198] sm:$0xff]  ;;  %v800_v15 = vld [vmem:[%s1371_s2 + $0x180] sm:$0xff] }
   0x6   :  { %89 = vmatprep.subr.mxu0 %v764_v9  ;;  %160 = vmatprep.subr.mxu1 %v771_v10  ;;  %v805_v16 = vld [vmem:[%s1371_s2 + $0x190] sm:$0xff]  ;;  %v812_v17 = vld [vmem:[%s1371_s2 + $0x168] sm:$0xff]  ;;  %v817_v18 = vld [vmem:[%s1371_s2 + $0x178] sm:$0xff] }
   0x7   :  { %90 = vmatpush1.msra.mxu0 %v776_v11  ;;  %161 = vmatpush1.msra.mxu1 %v781_v12  ;;  %v824_v19 = vld [vmem:[%s1371_s2 + $0x160] sm:$0xff]  ;;  %v829_v20 = vld [vmem:[%s1371_s2 + $0x170] sm:$0xff]  ;;  %v836_v21 = vld [vmem:[%s1371_s2 + $0x148] sm:$0xff] }
   0x8   :  { %91 = vmatprep.subr.mxu0 %v788_v13  ;;  %162 = vmatprep.subr.mxu1 %v793_v14  ;;  %v841_v22 = vld [vmem:[%s1371_s2 + $0x158] sm:$0xff]  ;;  %v848_v23 = vld [vmem:[%s1371_s2 + $0x140] sm:$0xff]  ;;  %v853_v24 = vld [vmem:[%s1371_s2 + $0x150] sm:$0xff] }
   0x9   :  { %92 = vmatpush1.msra.mxu0 %v800_v15  ;;  %163 = vmatpush1.msra.mxu1 %v805_v16  ;;  %v860_v25 = vld [vmem:[%s1371_s2 + $0x128] sm:$0xff]  ;;  %v865_v26 = vld [vmem:[%s1371_s2 + $0x138] sm:$0xff]  ;;  %v872_v27 = vld [vmem:[%s1371_s2 + $0x120] sm:$0xff] }
   0xa   :  { %93 = vmatprep.subr.mxu0 %v812_v17  ;;  %164 = vmatprep.subr.mxu1 %v817_v18  ;;  %v877_v28 = vld [vmem:[%s1371_s2 + $0x130] sm:$0xff]  ;;  %v884_v29 = vld [vmem:[%s1371_s2 + $0x108] sm:$0xff]  ;;  %v889_v30 = vld [vmem:[%s1371_s2 + $0x118] sm:$0xff] }
   0xb   :  { %94 = vmatpush1.msra.mxu0 %v824_v19  ;;  %165 = vmatpush1.msra.mxu1 %v829_v20  ;;  %v896_v31 = vld [vmem:[%s1371_s2 + $0x100] sm:$0xff]  ;;  %v901_v32 = vld [vmem:[%s1371_s2 + $0x110] sm:$0xff]  ;;  %v908_v33 = vld [vmem:[%s1371_s2 + $0xe8] sm:$0xff] }
   0xc   :  { %95 = vmatprep.subr.mxu0 %v836_v21  ;;  %166 = vmatprep.subr.mxu1 %v841_v22  ;;  %v913_v34 = vld [vmem:[%s1371_s2 + $0xf8] sm:$0xff]  ;;  %v920_v35 = vld [vmem:[%s1371_s2 + $0xe0] sm:$0xff]  ;;  %v925_v36 = vld [vmem:[%s1371_s2 + $0xf0] sm:$0xff] }
   0xd   :  { %96 = vmatpush1.msra.mxu0 %v848_v23  ;;  %167 = vmatpush1.msra.mxu1 %v853_v24  ;;  %v932_v37 = vld [vmem:[%s1371_s2 + $0xc8] sm:$0xff]  ;;  %v937_v38 = vld [vmem:[%s1371_s2 + $0xd8] sm:$0xff]  ;;  %v944_v39 = vld [vmem:[%s1371_s2 + $0xc0] sm:$0xff] }
   0xe   :  { %97 = vmatprep.subr.mxu0 %v860_v25  ;;  %168 = vmatprep.subr.mxu1 %v865_v26  ;;  %v949_v40 = vld [vmem:[%s1371_s2 + $0xd0] sm:$0xff]  ;;  %v956_v41 = vld [vmem:[%s1371_s2 + $0xa8] sm:$0xff]  ;;  %v961_v42 = vld [vmem:[%s1371_s2 + $0xb8] sm:$0xff] }
   0xf   :  { %98 = vmatpush1.msra.mxu0 %v872_v27  ;;  %169 = vmatpush1.msra.mxu1 %v877_v28  ;;  %v968_v43 = vld [vmem:[%s1371_s2 + $0xa0] sm:$0xff]  ;;  %v973_v44 = vld [vmem:[%s1371_s2 + $0xb0] sm:$0xff]  ;;  %v980_v45 = vld [vmem:[%s1371_s2 + $0x88] sm:$0xff] }
  0x10   :  { %99 = vmatprep.subr.mxu0 %v884_v29  ;;  %170 = vmatprep.subr.mxu1 %v889_v30  ;;  %v985_v46 = vld [vmem:[%s1371_s2 + $0x98] sm:$0xff]  ;;  %v992_v47 = vld [vmem:[%s1371_s2 + $0x80] sm:$0xff]  ;;  %v997_v48 = vld [vmem:[%s1371_s2 + $0x90] sm:$0xff] }
  0x11   :  { %100 = vmatpush1.msra.mxu0 %v896_v31  ;;  %171 = vmatpush1.msra.mxu1 %v901_v32  ;;  %v1004_v49 = vld [vmem:[%s1371_s2 + $0x68] sm:$0xff]  ;;  %v1009_v50 = vld [vmem:[%s1371_s2 + $0x78] sm:$0xff]  ;;  %v1016_v51 = vld [vmem:[%s1371_s2 + $0x60] sm:$0xff] }
  0x12   :  { %101 = vmatprep.subr.mxu0 %v908_v33  ;;  %172 = vmatprep.subr.mxu1 %v913_v34  ;;  %v1021_v52 = vld [vmem:[%s1371_s2 + $0x70] sm:$0xff]  ;;  %v1028_v53 = vld [vmem:[%s1371_s2 + $0x48] sm:$0xff]  ;;  %v1033_v54 = vld [vmem:[%s1371_s2 + $0x58] sm:$0xff] }
  0x13   :  { %102 = vmatpush1.msra.mxu0 %v920_v35  ;;  %173 = vmatpush1.msra.mxu1 %v925_v36  ;;  %v1040_v55 = vld [vmem:[%s1371_s2 + $0x40] sm:$0xff]  ;;  %v1045_v56 = vld [vmem:[%s1371_s2 + $0x50] sm:$0xff]  ;;  %v1052_v57 = vld [vmem:[%s1371_s2 + $0x28] sm:$0xff] }
  0x14   :  { %103 = vmatprep.subr.mxu0 %v932_v37  ;;  %174 = vmatprep.subr.mxu1 %v937_v38  ;;  %1380 = vst [vmem:[#allocation2_spill] sm:$0xff] %v1052_v57  ;;  %v1057_v58 = vld [vmem:[%s1371_s2 + $0x38] sm:$0xff]  ;;  %v1064_v59 = vld [vmem:[%s1371_s2 + $0x20] sm:$0xff]  ;;  %v1069_v60 = vld [vmem:[%s1371_s2 + $0x30] sm:$0xff] }
  0x15   :  { %104 = vmatpush1.msra.mxu0 %v944_v39  ;;  %175 = vmatpush1.msra.mxu1 %v949_v40  ;;  %v1076_v61 = vld [vmem:[%s1371_s2 + $0x8] sm:$0xff]  ;;  %v1081_v62 = vld [vmem:[%s1371_s2 + $0x18] sm:$0xff]  ;;  %v1088_v63 = vld [vmem:[%s1371_s2] sm:$0xff] }
  0x16   :  { %105 = vmatprep.subr.mxu0 %v956_v41  ;;  %176 = vmatprep.subr.mxu1 %v961_v42  ;;  %v1093_v3 = vld [vmem:[%s1371_s2 + $0x10] sm:$0xff] }
  0x17   :  { %106 = vmatpush1.msra.mxu0 %v968_v43  ;;  %177 = vmatpush1.msra.mxu1 %v973_v44 }
  0x18   :  { %107 = vmatprep.subr.mxu0 %v980_v45  ;;  %178 = vmatprep.subr.mxu1 %v985_v46 }
  0x19   :  { %108 = vmatpush1.msra.mxu0 %v992_v47  ;;  %179 = vmatpush1.msra.mxu1 %v997_v48 }
  0x1a   :  { %109 = vmatprep.subr.mxu0 %v1004_v49  ;;  %180 = vmatprep.subr.mxu1 %v1009_v50 }
  0x1b   :  { %110 = vmatpush1.msra.mxu0 %v1016_v51  ;;  %181 = vmatpush1.msra.mxu1 %v1021_v52 }
  0x1c   :  { %111 = vmatprep.subr.mxu0 %v1028_v53  ;;  %182 = vmatprep.subr.mxu1 %v1033_v54 }
  0x1d   :  { %112 = vmatpush1.msra.mxu0 %v1040_v55  ;;  %183 = vmatpush1.msra.mxu1 %v1045_v56 }
  0x1e   :  { %113 = vmatprep.subr.mxu0 %v1052_v57  ;;  %184 = vmatprep.subr.mxu1 %v1057_v58  ;;  %v84_v57 = vld [vmem:[%s1372_s0] sm:$0xff] }
  0x1f   :  { %114 = vmatpush1.msra.mxu0 %v1064_v59  ;;  %185 = vmatpush1.msra.mxu1 %v1069_v60 }
  0x20   :  { %115 = vmatprep.subr.mxu0 %v1076_v61  ;;  %186 = vmatprep.subr.mxu1 %v1081_v62 }
  0x21   :  { %116 = vmatpush1.msra.mxu0 %v1088_v63  ;;  %187 = vmatpush1.msra.mxu1 %v1093_v3 }
  0x22   :  { %150 = vmatmul.mubr.f32.vlgmr.msra.gmra.mxu0 %v84_v57  ;;  %221 = vmatmul.mubr.f32.vlgmr.msra.gmra.mxu1 %v84_v57  ;;  %v384_v57 = vld [vmem:[%s1374_s3 + $0x10] sm:$0xff] }
  0x23   :  { %232 = vmatprep.subr.mxu0 %v718_v0  ;;  %303 = vmatprep.subr.mxu1 %v723_v1  ;;  %v1381_v0 = vld [vmem:[#allocation2_spill] sm:$0xff] }
  0x24   :  { %233 = vmatpush1.msra.mxu0 %v728_v2  ;;  %304 = vmatpush1.msra.mxu1 %v737_v4  ;;  %v231_v1 = vld [vmem:[%s1373_s1] sm:$0xff]  ;;  %v1382_v2 = vmov 0.0   ;;  %v413_v4 = vld [vmem:[%s1374_s3 + $0xf8] sm:$0xff] }
  0x25   :  { %234 = vmatprep.subr.mxu0 %v742_v5  ;;  %305 = vmatprep.subr.mxu1 %v747_v6  ;;  %v445_v5 = vld [vmem:[%s1374_s3 + $0x1f8] sm:$0xff] }
  0x26   :  { %235 = vmatpush1.msra.mxu0 %v754_v7  ;;  %306 = vmatpush1.msra.mxu1 %v759_v8  ;;  %v397_v6 = vld [vmem:[%s1374_s3 + $0x78] sm:$0xff]  ;;  %v412_v7 = vld [vmem:[%s1374_s3 + $0xf0] sm:$0xff] }
  0x27   :  { %236 = vmatprep.subr.mxu0 %v764_v9  ;;  %307 = vmatprep.subr.mxu1 %v771_v10  ;;  %v444_v8 = vld [vmem:[%s1374_s3 + $0x1f0] sm:$0xff] }
  0x28   :  { %237 = vmatpush1.msra.mxu0 %v776_v11  ;;  %308 = vmatpush1.msra.mxu1 %v781_v12  ;;  %v396_v9 = vld [vmem:[%s1374_s3 + $0x70] sm:$0xff]  ;;  %v411_v11 = vld [vmem:[%s1374_s3 + $0xe8] sm:$0xff] }
  0x29   :  { %238 = vmatprep.subr.mxu0 %v788_v13  ;;  %309 = vmatprep.subr.mxu1 %v793_v14  ;;  %v428_v10 = vld [vmem:[%s1374_s3 + $0x170] sm:$0xff]  ;;  %v443_v12 = vld [vmem:[%s1374_s3 + $0x1e8] sm:$0xff] }
  0x2a   :  { %239 = vmatpush1.msra.mxu0 %v800_v15  ;;  %310 = vmatpush1.msra.mxu1 %v805_v16  ;;  %v395_v13 = vld [vmem:[%s1374_s3 + $0x68] sm:$0xff]  ;;  %v410_v15 = vld [vmem:[%s1374_s3 + $0xe0] sm:$0xff] }
  0x2b   :  { %240 = vmatprep.subr.mxu0 %v812_v17  ;;  %311 = vmatprep.subr.mxu1 %v817_v18  ;;  %v427_v14 = vld [vmem:[%s1374_s3 + $0x168] sm:$0xff]  ;;  %v442_v16 = vld [vmem:[%s1374_s3 + $0x1e0] sm:$0xff] }
  0x2c   :  { %241 = vmatpush1.msra.mxu0 %v824_v19  ;;  %312 = vmatpush1.msra.mxu1 %v829_v20  ;;  %v394_v17 = vld [vmem:[%s1374_s3 + $0x60] sm:$0xff]  ;;  %v409_v19 = vld [vmem:[%s1374_s3 + $0xd8] sm:$0xff] }
  0x2d   :  { %242 = vmatprep.subr.mxu0 %v836_v21  ;;  %313 = vmatprep.subr.mxu1 %v841_v22  ;;  %v426_v18 = vld [vmem:[%s1374_s3 + $0x160] sm:$0xff]  ;;  %v441_v20 = vld [vmem:[%s1374_s3 + $0x1d8] sm:$0xff] }
  0x2e   :  { %243 = vmatpush1.msra.mxu0 %v848_v23  ;;  %314 = vmatpush1.msra.mxu1 %v853_v24  ;;  %v393_v21 = vld [vmem:[%s1374_s3 + $0x58] sm:$0xff]  ;;  %v408_v23 = vld [vmem:[%s1374_s3 + $0xd0] sm:$0xff] }
  0x2f   :  { %244 = vmatprep.subr.mxu0 %v860_v25  ;;  %315 = vmatprep.subr.mxu1 %v865_v26  ;;  %v425_v22 = vld [vmem:[%s1374_s3 + $0x158] sm:$0xff]  ;;  %v440_v24 = vld [vmem:[%s1374_s3 + $0x1d0] sm:$0xff] }
  0x30   :  { %245 = vmatpush1.msra.mxu0 %v872_v27  ;;  %316 = vmatpush1.msra.mxu1 %v877_v28  ;;  %v392_v25 = vld [vmem:[%s1374_s3 + $0x50] sm:$0xff]  ;;  %v407_v27 = vld [vmem:[%s1374_s3 + $0xc8] sm:$0xff] }
  0x31   :  { %246 = vmatprep.subr.mxu0 %v884_v29  ;;  %317 = vmatprep.subr.mxu1 %v889_v30  ;;  %v424_v26 = vld [vmem:[%s1374_s3 + $0x150] sm:$0xff]  ;;  %v439_v28 = vld [vmem:[%s1374_s3 + $0x1c8] sm:$0xff] }
  0x32   :  { %247 = vmatpush1.msra.mxu0 %v896_v31  ;;  %318 = vmatpush1.msra.mxu1 %v901_v32  ;;  %v391_v29 = vld [vmem:[%s1374_s3 + $0x48] sm:$0xff]  ;;  %v406_v31 = vld [vmem:[%s1374_s3 + $0xc0] sm:$0xff] }
  0x33   :  { %248 = vmatprep.subr.mxu0 %v908_v33  ;;  %319 = vmatprep.subr.mxu1 %v913_v34  ;;  %v423_v30 = vld [vmem:[%s1374_s3 + $0x148] sm:$0xff]  ;;  %v438_v32 = vld [vmem:[%s1374_s3 + $0x1c0] sm:$0xff] }
  0x34   :  { %249 = vmatpush1.msra.mxu0 %v920_v35  ;;  %320 = vmatpush1.msra.mxu1 %v925_v36  ;;  %v390_v33 = vld [vmem:[%s1374_s3 + $0x40] sm:$0xff]  ;;  %v405_v35 = vld [vmem:[%s1374_s3 + $0xb8] sm:$0xff] }
  0x35   :  { %250 = vmatprep.subr.mxu0 %v932_v37  ;;  %321 = vmatprep.subr.mxu1 %v937_v38  ;;  %v422_v34 = vld [vmem:[%s1374_s3 + $0x140] sm:$0xff]  ;;  %v437_v36 = vld [vmem:[%s1374_s3 + $0x1b8] sm:$0xff] }
  0x36   :  { %251 = vmatpush1.msra.mxu0 %v944_v39  ;;  %322 = vmatpush1.msra.mxu1 %v949_v40  ;;  %v389_v37 = vld [vmem:[%s1374_s3 + $0x38] sm:$0xff]  ;;  %v404_v39 = vld [vmem:[%s1374_s3 + $0xb0] sm:$0xff] }
  0x37   :  { %252 = vmatprep.subr.mxu0 %v956_v41  ;;  %323 = vmatprep.subr.mxu1 %v961_v42  ;;  %v421_v38 = vld [vmem:[%s1374_s3 + $0x138] sm:$0xff]  ;;  %v436_v40 = vld [vmem:[%s1374_s3 + $0x1b0] sm:$0xff] }
  0x38   :  { %253 = vmatpush1.msra.mxu0 %v968_v43  ;;  %324 = vmatpush1.msra.mxu1 %v973_v44  ;;  %v388_v41 = vld [vmem:[%s1374_s3 + $0x30] sm:$0xff]  ;;  %v403_v43 = vld [vmem:[%s1374_s3 + $0xa8] sm:$0xff] }
  0x39   :  { %254 = vmatprep.subr.mxu0 %v980_v45  ;;  %325 = vmatprep.subr.mxu1 %v985_v46  ;;  %v420_v42 = vld [vmem:[%s1374_s3 + $0x130] sm:$0xff]  ;;  %v435_v44 = vld [vmem:[%s1374_s3 + $0x1a8] sm:$0xff] }
  0x3a   :  { %255 = vmatpush1.msra.mxu0 %v992_v47  ;;  %326 = vmatpush1.msra.mxu1 %v997_v48  ;;  %v387_v45 = vld [vmem:[%s1374_s3 + $0x28] sm:$0xff]  ;;  %v402_v47 = vld [vmem:[%s1374_s3 + $0xa0] sm:$0xff] }
  0x3b   :  { %256 = vmatprep.subr.mxu0 %v1004_v49  ;;  %327 = vmatprep.subr.mxu1 %v1009_v50  ;;  %v419_v46 = vld [vmem:[%s1374_s3 + $0x128] sm:$0xff]  ;;  %v434_v48 = vld [vmem:[%s1374_s3 + $0x1a0] sm:$0xff] }
  0x3c   :  { %257 = vmatpush1.msra.mxu0 %v1016_v51  ;;  %328 = vmatpush1.msra.mxu1 %v1021_v52  ;;  %v386_v49 = vld [vmem:[%s1374_s3 + $0x20] sm:$0xff]  ;;  %v401_v51 = vld [vmem:[%s1374_s3 + $0x98] sm:$0xff] }
  0x3d   :  { %258 = vmatprep.subr.mxu0 %v1028_v53  ;;  %329 = vmatprep.subr.mxu1 %v1033_v54  ;;  %v418_v50 = vld [vmem:[%s1374_s3 + $0x120] sm:$0xff]  ;;  %v433_v52 = vld [vmem:[%s1374_s3 + $0x198] sm:$0xff] }
  0x3e   :  { %259 = vmatpush1.msra.mxu0 %v1040_v55  ;;  %330 = vmatpush1.msra.mxu1 %v1045_v56  ;;  %v385_v53 = vld [vmem:[%s1374_s3 + $0x18] sm:$0xff]  ;;  %v400_v55 = vld [vmem:[%s1374_s3 + $0x90] sm:$0xff] }
  0x3f   :  { %260 = vmatprep.subr.mxu0 %v1381_v0  ;;  %331 = vmatprep.subr.mxu1 %v1057_v58  ;;  %v417_v54 = vld [vmem:[%s1374_s3 + $0x118] sm:$0xff]  ;;  %v432_v56 = vld [vmem:[%s1374_s3 + $0x190] sm:$0xff]  ;;  %v430_v0 = vld [vmem:[%s1374_s3 + $0x180] sm:$0xff] }
  0x40   :  { %261 = vmatpush1.msra.mxu0 %v1064_v59  ;;  %332 = vmatpush1.msra.mxu1 %v1069_v60  ;;  %v416_v58 = vld [vmem:[%s1374_s3 + $0x110] sm:$0xff]  ;;  %v399_v59 = vld [vmem:[%s1374_s3 + $0x88] sm:$0xff] }
  0x41   :  { %262 = vmatprep.subr.mxu0 %v1076_v61  ;;  %333 = vmatprep.subr.mxu1 %v1081_v62  ;;  %v431_v60 = vld [vmem:[%s1374_s3 + $0x188] sm:$0xff] }
  0x42   :  { %263 = vmatpush1.msra.mxu0 %v1088_v63  ;;  %296 = vmatprep.mubr.f32.mxu0 %v1382_v2  ;;  %v383_v61 = vld [vmem:[%s1374_s3 + $0x8] sm:$0xff]  ;;  %v398_v63 = vld [vmem:[%s1374_s3 + $0x80] sm:$0xff] }
  0x43   :  { %334 = vmatpush1.msra.mxu1 %v1093_v3  ;;  %367 = vmatprep.mubr.f32.mxu1 %v1382_v2  ;;  %v429_v3 = vld [vmem:[%s1374_s3 + $0x178] sm:$0xff]  ;;  %v415_v62 = vld [vmem:[%s1374_s3 + $0x108] sm:$0xff]  ;;  %v414_v2 = vld [vmem:[%s1374_s3 + $0x100] sm:$0xff] }
  0x44   :  { %297 = vmatmul.mubr.f32.vlgmr.msra.gmra.mxu0 %v231_v1  ;;  %368 = vmatmul.mubr.f32.vlgmr.msra.gmra.mxu1 %v231_v1  ;;  %v382_v1 = vld [vmem:[%s1374_s3] sm:$0xff] }
  0x45   :  { %613 = vmatprep.subr.mxu0 %v413_v4  ;;  %648 = vmatprep.subr.mxu1 %v445_v5 }
  0x46   :  { %614 = vmatpush3.msra.mxu0 %v397_v6  ;;  %649 = vmatpush3.msra.mxu1 %v429_v3 }
  0x47   :  { %615 = vmatprep.subr.mxu0 %v412_v7  ;;  %650 = vmatprep.subr.mxu1 %v444_v8 }
  0x48   :  { %616 = vmatpush3.msra.mxu0 %v396_v9  ;;  %651 = vmatpush3.msra.mxu1 %v428_v10 }
  0x49   :  { %617 = vmatprep.subr.mxu0 %v411_v11  ;;  %652 = vmatprep.subr.mxu1 %v443_v12 }
  0x4a   :  { %618 = vmatpush3.msra.mxu0 %v395_v13  ;;  %653 = vmatpush3.msra.mxu1 %v427_v14 }
  0x4b   :  { %619 = vmatprep.subr.mxu0 %v410_v15  ;;  %654 = vmatprep.subr.mxu1 %v442_v16 }
  0x4c   :  { %620 = vmatpush3.msra.mxu0 %v394_v17  ;;  %655 = vmatpush3.msra.mxu1 %v426_v18 }
  0x4d   :  { %621 = vmatprep.subr.mxu0 %v409_v19  ;;  %656 = vmatprep.subr.mxu1 %v441_v20 }
  0x4e   :  { %622 = vmatpush3.msra.mxu0 %v393_v21  ;;  %657 = vmatpush3.msra.mxu1 %v425_v22 }
  0x4f   :  { %623 = vmatprep.subr.mxu0 %v408_v23  ;;  %658 = vmatprep.subr.mxu1 %v440_v24 }
  0x50   :  { %624 = vmatpush3.msra.mxu0 %v392_v25  ;;  %659 = vmatpush3.msra.mxu1 %v424_v26 }
  0x51   :  { %625 = vmatprep.subr.mxu0 %v407_v27  ;;  %660 = vmatprep.subr.mxu1 %v439_v28 }
  0x52   :  { %626 = vmatpush3.msra.mxu0 %v391_v29  ;;  %661 = vmatpush3.msra.mxu1 %v423_v30  ;;  %v612_v29 = vld [vmem:[%s1375_s4] ss:$0 sm:$0xff] }
  0x53   :  { %627 = vmatprep.subr.mxu0 %v406_v31  ;;  %662 = vmatprep.subr.mxu1 %v438_v32 }
  0x54   :  { %628 = vmatpush3.msra.mxu0 %v390_v33  ;;  %663 = vmatpush3.msra.mxu1 %v422_v34 }
  0x55   :  { %629 = vmatprep.subr.mxu0 %v405_v35  ;;  %664 = vmatprep.subr.mxu1 %v437_v36 }
  0x56   :  { %630 = vmatpush3.msra.mxu0 %v389_v37  ;;  %665 = vmatpush3.msra.mxu1 %v421_v38 }
  0x57   :  { %631 = vmatprep.subr.mxu0 %v404_v39  ;;  %666 = vmatprep.subr.mxu1 %v436_v40 }
  0x58   :  { %632 = vmatpush3.msra.mxu0 %v388_v41  ;;  %667 = vmatpush3.msra.mxu1 %v420_v42 }
  0x59   :  { %633 = vmatprep.subr.mxu0 %v403_v43  ;;  %668 = vmatprep.subr.mxu1 %v435_v44 }
  0x5a   :  { %634 = vmatpush3.msra.mxu0 %v387_v45  ;;  %669 = vmatpush3.msra.mxu1 %v419_v46 }
  0x5b   :  { %635 = vmatprep.subr.mxu0 %v402_v47  ;;  %670 = vmatprep.subr.mxu1 %v434_v48 }
  0x5c   :  { %636 = vmatpush3.msra.mxu0 %v386_v49  ;;  %671 = vmatpush3.msra.mxu1 %v418_v50 }
  0x5d   :  { %637 = vmatprep.subr.mxu0 %v401_v51  ;;  %672 = vmatprep.subr.mxu1 %v433_v52 }
  0x5e   :  { %638 = vmatpush3.msra.mxu0 %v385_v53  ;;  %673 = vmatpush3.msra.mxu1 %v417_v54 }
  0x5f   :  { %639 = vmatprep.subr.mxu0 %v400_v55  ;;  %674 = vmatprep.subr.mxu1 %v432_v56 }
  0x60   :  { %640 = vmatpush3.msra.mxu0 %v384_v57  ;;  %675 = vmatpush3.msra.mxu1 %v416_v58 }
  0x61   :  { %641 = vmatprep.subr.mxu0 %v399_v59  ;;  %676 = vmatprep.subr.mxu1 %v431_v60 }
  0x62   :  { %642 = vmatpush3.msra.mxu0 %v383_v61  ;;  %677 = vmatpush3.msra.mxu1 %v415_v62 }
  0x63   :  { %643 = vmatprep.subr.mxu0 %v398_v63  ;;  %678 = vmatprep.subr.mxu1 %v430_v0 }
  0x64   :  { %644 = vmatpush3.msra.mxu0 %v382_v1  ;;  %679 = vmatpush3.msra.mxu1 %v414_v2 }
  0xe2   :  { %v151_v4 = vpop.f32.mrf.mxu0  ;;  %v222_v5 = vpop.f32.mrf.mxu1 }
  0xe3   :  { %v227_v17 = vmax.f32 %v151_v4, 0.0  ;;  %v229_v18 = vmax.f32 %v222_v5, 0.0 }
  0xe4   :  { %v153_v6 = vpop.f32.mrf.mxu0  ;;  %v224_v3 = vpop.f32.mrf.mxu1 }
  0xe5   :  { %v228_v13 = vmax.f32 %v153_v6, 0.0  ;;  %v230_v14 = vmax.f32 %v224_v3, 0.0 }
 0x104   :  { %v298_v7 = vpop.f32.mrf.mxu0  ;;  %v369_v8 = vpop.f32.mrf.mxu1 }
 0x105   :  { %v374_v9 = vmax.f32 %v298_v7, 0.0  ;;  %v376_v10 = vmax.f32 %v369_v8, 0.0 }
 0x106   :  { %v300_v11 = vpop.f32.mrf.mxu0  ;;  %v371_v12 = vpop.f32.mrf.mxu1 }
 0x107   :  { %v375_v15 = vmax.f32 %v300_v11, 0.0  ;;  %v377_v16 = vmax.f32 %v371_v12, 0.0  ;;  %v378_v21 = vadd.f32 %v374_v9, %v227_v17  ;;  %v380_v22 = vadd.f32 %v376_v10, %v229_v18 }
 0x109   :  { %v379_v19 = vadd.f32 %v375_v15, %v228_v13  ;;  %v381_v20 = vadd.f32 %v377_v16, %v230_v14 }
 0x10b   :  { %510 = vmatprep.mubr.f32.mxu0 %v379_v19  ;;  %580 = vmatprep.mubr.f32.mxu1 %v381_v20 }
 0x10c   :  { %511 = vmatmul.mubr.f32.vlgmr.msra.gmra.mxu0 %v378_v21  ;;  %581 = vmatmul.mubr.f32.vlgmr.msra.gmra.mxu1 %v380_v22 }
 0x1cc   :  { %v645_v23 = vpop.f32.mrf.mxu0  ;;  %v680_v24 = vpop.f32.mrf.mxu1 }
 0x1ce   :  { %v646_v25 = vpop.f32.mrf.mxu0  ;;  %v681_v26 = vpop.f32.mrf.mxu1 }
 0x1cf   :  { %v647_v27 = vadd.f32 %v646_v25, %v645_v23  ;;  %v682_v28 = vadd.f32 %v681_v26, %v680_v24 }
 0x1d1   :  { %v583_v30 = vadd.f32 %v682_v28, %v647_v27 }
 0x1d3   :  { %v597_v31 = vadd.f32 %v612_v29, %v583_v30 }
 0x1d5   :  { %599 = vst.msk [vmem:[%s1376_s5] sm:$0xff] %vm598_vm0, %v597_v31 }

</bundles_post_ra>
